<compile_context>
chip_gen: v7x
topology: tpu7x:2x2x1
jax: 0.10.0
libtpu: 0.0.40
codegen_flags: <defaults>
</compile_context>

<pallas_src>
import functools

import jax
import jax.numpy as jnp
from jax.experimental import pallas as pl
from jax.experimental.pallas import tpu as pltpu

LANE = 128


def _round_up(n, m):
    return ((n + m - 1) // m) * m


def _cdiv(a, b):
    return (a + b - 1) // b


def _mlp_kernel(x_ref, w0_ref, w1_ref, w2_ref, w3_ref, w4_ref, b_ref, o_ref, *,
                out_dim):
    # x tile: (TB, input_dim). Weights are BN-folded, zero-padded to a common
    # 128-lane width and stored in bf16; b_ref rows 0..4 hold the folded f32
    # biases. All matmuls run bf16 x bf16 -> f32 accumulation on the MXU.
    cdt = w0_ref.dtype  # bf16
    h = x_ref[...].astype(cdt)

    h = jnp.dot(h, w0_ref[...], preferred_element_type=jnp.float32) + b_ref[0:1, :]
    h = jnp.maximum(h, 0.0).astype(cdt)

    h = jnp.dot(h, w1_ref[...], preferred_element_type=jnp.float32) + b_ref[1:2, :]
    h = jnp.maximum(h, 0.0).astype(cdt)

    # Dropout after this block's ReLU is identity in eval mode.
    h = jnp.dot(h, w2_ref[...], preferred_element_type=jnp.float32) + b_ref[2:3, :]
    h = jnp.maximum(h, 0.0).astype(cdt)

    h = jnp.dot(h, w3_ref[...], preferred_element_type=jnp.float32) + b_ref[3:4, :]
    h = jnp.maximum(h, 0.0).astype(cdt)

    h = jnp.dot(h, w4_ref[...], preferred_element_type=jnp.float32) + b_ref[4:5, :]
    # Narrow store: only the real out_dim columns ever hit HBM.
    o_ref[...] = h[:, :out_dim].astype(o_ref.dtype)


def late_fusion_mlp_pallas(x, packed_ws, packed_b, out_dim, *, block_b=2048):
    """x: [B, input_dim] f32 (or bf16).
    packed_ws: list of 5 BN-folded, zero-padded (K, 128k) bf16 weights.
    packed_b : (8, 128k) f32 packed folded biases (rows 0..4 used).
    Returns [B, out_dim] f32."""
    B, in_dim = x.shape

    # Batch tile: multiple of 8 sublanes, as large as block_b allows, but
    # capped so the grid has >=2 steps (both v7x TensorCores get work).
    TB = max(8, min(block_b, _round_up(_cdiv(B, 2), 8)))
    grid = (_cdiv(B, TB),)  # ragged last block handled by Pallas masking

    def const_spec(shape):
        # Same block every grid step -> stays resident in VMEM (loaded once).
        return pl.BlockSpec(shape, lambda i: (0, 0))

    in_specs = (
        [pl.BlockSpec((TB, in_dim), lambda i: (i, 0))]      # x tile, pipelined
        + [const_spec(w.shape) for w in packed_ws]          # resident weights
        + [const_spec(packed_b.shape)]                      # resident packed biases
    )
    # Output block last dim == full array dim (out_dim), so lanes < 128 are legal.
    out_spec = pl.BlockSpec((TB, out_dim), lambda i: (i, 0))

    return pl.pallas_call(
        functools.partial(_mlp_kernel, out_dim=out_dim),
        out_shape=jax.ShapeDtypeStruct((B, out_dim), jnp.float32),
        grid_spec=pl.GridSpec(
            grid=grid,
            in_specs=in_specs,
            out_specs=out_spec,
        ),
        compiler_params=pltpu.CompilerParams(
            dimension_semantics=("parallel",),
        ),
    )(x, *packed_ws, packed_b)


def init_raw_params(key, input_dim, hidden_dims, output_dim):
    """Torch-shaped synthetic parameters for the module (4x Linear+BN, 1x Linear)."""
    dims = [input_dim] + list(hidden_dims) + [output_dim]
    keys = jax.random.split(key, 32)
    ki = iter(range(len(keys)))
    layers = []
    for li in range(4):
        fi, fo = dims[li], dims[li + 1]
        layers.append(dict(
            w=jax.random.normal(keys[next(ki)], (fi, fo), jnp.float32) / jnp.sqrt(fi),
            b=0.01 * jax.random.normal(keys[next(ki)], (fo,), jnp.float32),
            gamma=1.0 + 0.1 * jax.random.normal(keys[next(ki)], (fo,), jnp.float32),
            beta=0.1 * jax.random.normal(keys[next(ki)], (fo,), jnp.float32),
            mean=0.1 * jax.random.normal(keys[next(ki)], (fo,), jnp.float32),
            var=0.5 + jnp.abs(jax.random.normal(keys[next(ki)], (fo,), jnp.float32)),
        ))
    fi, fo = dims[4], dims[5]
    layers.append(dict(
        w=jax.random.normal(keys[next(ki)], (fi, fo), jnp.float32) / jnp.sqrt(fi),
        b=0.01 * jax.random.normal(keys[next(ki)], (fo,), jnp.float32),
    ))
    return layers


def pack_params(layers, eps=1e-5, weight_dtype=jnp.bfloat16):
    """Fold eval-mode BN into the Linear weights/biases, zero-pad all output
    feature dims to a common multiple of 128 lanes, and cast weights to bf16.
    Biases stay f32 (added to the f32 accumulator).  Padded weight columns and
    padded bias lanes MUST stay zero (relu(0+0)=0 invariant for later layers).
    Returns (list of 5 padded bf16 weights, (8, pad) packed f32 bias buffer)."""
    out_dims = [l["w"].shape[1] for l in layers]
    pad = max(_round_up(d, LANE) for d in out_dims)

    ws, bs = [], []
    for i, l in enumerate(layers):
        w, b = l["w"], l["b"]
        if "gamma" in l:  # fold BatchNorm affine into the Linear
            scale = l["gamma"] / jnp.sqrt(l["var"] + eps)
            shift = l["beta"] - l["mean"] * scale
            w = w * scale[None, :]
            b = b * scale + shift
        fi, fo = w.shape
        in_pad = fi if i == 0 else pad            # first layer keeps true input_dim
        wp = jnp.zeros((in_pad, pad), jnp.float32).at[:fi, :fo].set(w)
        bp = jnp.zeros((pad,), jnp.float32).at[:fo].set(b)
        ws.append(wp.astype(weight_dtype))
        bs.append(bp)

    b_buf = jnp.zeros((8, pad), jnp.float32).at[:len(bs), :].set(jnp.stack(bs))
    return ws, b_buf


def reference_forward(x, layers, eps=1e-5):
    """Pure-JAX f32 reference of the eval-mode forward from the UNfolded params."""
    h = x
    for l in layers[:4]:
        h = h @ l["w"] + l["b"]
        h = (h - l["mean"]) / jnp.sqrt(l["var"] + eps) * l["gamma"] + l["beta"]
        h = jnp.maximum(h, 0.0)
    l = layers[4]
    return h @ l["w"] + l["b"]


def reference_forward_packed(x, packed_ws, packed_b, out_dim):
    """Pure-JAX reference using the SAME folded/padded bf16 operands as the
    kernel (bf16 dots, f32 accumulation) — isolates kernel bugs from bf16
    quantization error."""
    h = x
    for i in range(4):
        h = jnp.dot(h.astype(packed_ws[i].dtype), packed_ws[i],
                    preferred_element_type=jnp.float32) + packed_b[i]
        h = jnp.maximum(h, 0.0)
    h = jnp.dot(h.astype(packed_ws[4].dtype), packed_ws[4],
                preferred_element_type=jnp.float32) + packed_b[4]
    return h[:, :out_dim]


if __name__ == "__main__":
    # Shapes consistent with the module:
    # arg = {'hidden_dim': [64, 64, 32, 32], 'dropout': 0.1, 'output_dim': 8}
    input_dim = 32
    hidden_dim = [64, 64, 32, 32]
    output_dim = 8
    batch = 12   # not a multiple of the batch tile -> exercises the ragged last block

    key = jax.random.PRNGKey(0)
    kx, kp = jax.random.split(key)
    x = jax.random.normal(kx, (batch, input_dim), jnp.float32)

    layers = init_raw_params(kp, input_dim, hidden_dim, output_dim)
    packed_ws, packed_b = pack_params(layers)

    # TB is auto-capped to round_up(cdiv(12,2),8)=8 -> grid=(2,), exercising
    # batch tiling, the resident-weight path, and masked ragged output writes.
    out = late_fusion_mlp_pallas(x, packed_ws, packed_b, output_dim, block_b=2048)
    out = jax.block_until_ready(out)

    assert out.shape == (batch, output_dim)

    # Structural check: same folded bf16 operands in pure JAX -> tight match.
    ref_packed = reference_forward_packed(x, packed_ws, packed_b, output_dim)
    assert jnp.allclose(out, ref_packed, atol=5e-3, rtol=5e-3), \
        "mismatch vs packed bf16 reference"

    # Semantic check vs the f32 eval-mode module (tolerance covers bf16 quantization).
    ref = reference_forward(x, layers)
    assert jnp.allclose(out, ref, atol=5e-2, rtol=5e-2), \
        "mismatch vs f32 module reference"

    print("KERNEL_OK")
</pallas_src>

<mosaic_0001>
module attributes {stable_mosaic.version = 11 : i64} {
  func.func @_mlp_kernel(%arg0: i32, %arg1: memref<8x32xf32, #tpu.memory_space<vmem>>, %arg2: memref<32x128xbf16, #tpu.memory_space<vmem>>, %arg3: memref<128x128xbf16, #tpu.memory_space<vmem>>, %arg4: memref<128x128xbf16, #tpu.memory_space<vmem>>, %arg5: memref<128x128xbf16, #tpu.memory_space<vmem>>, %arg6: memref<128x128xbf16, #tpu.memory_space<vmem>>, %arg7: memref<8x128xf32, #tpu.memory_space<vmem>>, %arg8: memref<8x8xf32, #tpu.memory_space<vmem>>) attributes {dimension_semantics = [#tpu.dimension_semantics<parallel>], iteration_bounds = array<i64: 2>, scalar_prefetch = 0 : i64, scratch_operands = 0 : i64, tpu.core_type = #tpu.core_type<tc>, window_params = [{transform_indices = @transform_0, window_bounds = array<i64: 8, 32>}, {pipeline_mode = #tpu.pipeline_mode<synchronous>, transform_indices = @transform_1, window_bounds = array<i64: 32, 128>}, {pipeline_mode = #tpu.pipeline_mode<synchronous>, transform_indices = @transform_2, window_bounds = array<i64: 128, 128>}, {pipeline_mode = #tpu.pipeline_mode<synchronous>, transform_indices = @transform_3, window_bounds = array<i64: 128, 128>}, {pipeline_mode = #tpu.pipeline_mode<synchronous>, transform_indices = @transform_4, window_bounds = array<i64: 128, 128>}, {pipeline_mode = #tpu.pipeline_mode<synchronous>, transform_indices = @transform_5, window_bounds = array<i64: 128, 128>}, {pipeline_mode = #tpu.pipeline_mode<synchronous>, transform_indices = @transform_6, window_bounds = array<i64: 8, 128>}, {transform_indices = @transform_7, window_bounds = array<i64: 8, 8>}]} {
    %c0 = arith.constant 0 : index
    %c0_0 = arith.constant 0 : index
    %0 = vector.load %arg1[%c0, %c0_0] : memref<8x32xf32, #tpu.memory_space<vmem>>, vector<8x32xf32>
    %1 = arith.truncf %0 : vector<8x32xf32> to vector<8x32xbf16>
    %c0_1 = arith.constant 0 : index
    %c0_2 = arith.constant 0 : index
    %2 = vector.load %arg2[%c0_1, %c0_2] : memref<32x128xbf16, #tpu.memory_space<vmem>>, vector<32x128xbf16>
    %cst = arith.constant dense<0.000000e+00> : vector<8x128xf32>
    %3 = tpu.matmul %1, %2, %cst {dimension_numbers = #tpu.dot_dimension_numbers<[1], [0], [0], [1], [0, 0, 1, 1], [], []>} : vector<8x32xbf16>, vector<32x128xbf16>, vector<8x128xf32> -> vector<8x128xf32>
    %c0_3 = arith.constant 0 : index
    %c0_4 = arith.constant 0 : index
    %4 = vector.load %arg7[%c0_3, %c0_4] : memref<8x128xf32, #tpu.memory_space<vmem>>, vector<1x128xf32>
    %5 = vector.broadcast %4 : vector<1x128xf32> to vector<8x128xf32>
    %6 = arith.addf %3, %5 : vector<8x128xf32>
    %cst_5 = arith.constant 0.000000e+00 : f32
    %7 = vector.broadcast %cst_5 : f32 to vector<8x128xf32>
    %8 = arith.maximumf %6, %7 : vector<8x128xf32>
    %9 = arith.truncf %8 : vector<8x128xf32> to vector<8x128xbf16>
    %c0_6 = arith.constant 0 : index
    %c0_7 = arith.constant 0 : index
    %10 = vector.load %arg3[%c0_6, %c0_7] : memref<128x128xbf16, #tpu.memory_space<vmem>>, vector<128x128xbf16>
    %cst_8 = arith.constant dense<0.000000e+00> : vector<8x128xf32>
    %11 = tpu.matmul %9, %10, %cst_8 {dimension_numbers = #tpu.dot_dimension_numbers<[1], [0], [0], [1], [0, 0, 1, 1], [], []>} : vector<8x128xbf16>, vector<128x128xbf16>, vector<8x128xf32> -> vector<8x128xf32>
    %c1 = arith.constant 1 : index
    %c0_9 = arith.constant 0 : index
    %12 = vector.load %arg7[%c1, %c0_9] : memref<8x128xf32, #tpu.memory_space<vmem>>, vector<1x128xf32>
    %13 = vector.broadcast %12 : vector<1x128xf32> to vector<8x128xf32>
    %14 = arith.addf %11, %13 : vector<8x128xf32>
    %cst_10 = arith.constant 0.000000e+00 : f32
    %15 = vector.broadcast %cst_10 : f32 to vector<8x128xf32>
    %16 = arith.maximumf %14, %15 : vector<8x128xf32>
    %17 = arith.truncf %16 : vector<8x128xf32> to vector<8x128xbf16>
    %c0_11 = arith.constant 0 : index
    %c0_12 = arith.constant 0 : index
    %18 = vector.load %arg4[%c0_11, %c0_12] : memref<128x128xbf16, #tpu.memory_space<vmem>>, vector<128x128xbf16>
    %cst_13 = arith.constant dense<0.000000e+00> : vector<8x128xf32>
    %19 = tpu.matmul %17, %18, %cst_13 {dimension_numbers = #tpu.dot_dimension_numbers<[1], [0], [0], [1], [0, 0, 1, 1], [], []>} : vector<8x128xbf16>, vector<128x128xbf16>, vector<8x128xf32> -> vector<8x128xf32>
    %c2 = arith.constant 2 : index
    %c0_14 = arith.constant 0 : index
    %20 = vector.load %arg7[%c2, %c0_14] : memref<8x128xf32, #tpu.memory_space<vmem>>, vector<1x128xf32>
    %21 = vector.broadcast %20 : vector<1x128xf32> to vector<8x128xf32>
    %22 = arith.addf %19, %21 : vector<8x128xf32>
    %cst_15 = arith.constant 0.000000e+00 : f32
    %23 = vector.broadcast %cst_15 : f32 to vector<8x128xf32>
    %24 = arith.maximumf %22, %23 : vector<8x128xf32>
    %25 = arith.truncf %24 : vector<8x128xf32> to vector<8x128xbf16>
    %c0_16 = arith.constant 0 : index
    %c0_17 = arith.constant 0 : index
    %26 = vector.load %arg5[%c0_16, %c0_17] : memref<128x128xbf16, #tpu.memory_space<vmem>>, vector<128x128xbf16>
    %cst_18 = arith.constant dense<0.000000e+00> : vector<8x128xf32>
    %27 = tpu.matmul %25, %26, %cst_18 {dimension_numbers = #tpu.dot_dimension_numbers<[1], [0], [0], [1], [0, 0, 1, 1], [], []>} : vector<8x128xbf16>, vector<128x128xbf16>, vector<8x128xf32> -> vector<8x128xf32>
    %c3 = arith.constant 3 : index
    %c0_19 = arith.constant 0 : index
    %28 = vector.load %arg7[%c3, %c0_19] : memref<8x128xf32, #tpu.memory_space<vmem>>, vector<1x128xf32>
    %29 = vector.broadcast %28 : vector<1x128xf32> to vector<8x128xf32>
    %30 = arith.addf %27, %29 : vector<8x128xf32>
    %cst_20 = arith.constant 0.000000e+00 : f32
    %31 = vector.broadcast %cst_20 : f32 to vector<8x128xf32>
    %32 = arith.maximumf %30, %31 : vector<8x128xf32>
    %33 = arith.truncf %32 : vector<8x128xf32> to vector<8x128xbf16>
    %c0_21 = arith.constant 0 : index
    %c0_22 = arith.constant 0 : index
    %34 = vector.load %arg6[%c0_21, %c0_22] : memref<128x128xbf16, #tpu.memory_space<vmem>>, vector<128x128xbf16>
    %cst_23 = arith.constant dense<0.000000e+00> : vector<8x128xf32>
    %35 = tpu.matmul %33, %34, %cst_23 {dimension_numbers = #tpu.dot_dimension_numbers<[1], [0], [0], [1], [0, 0, 1, 1], [], []>} : vector<8x128xbf16>, vector<128x128xbf16>, vector<8x128xf32> -> vector<8x128xf32>
    %c4 = arith.constant 4 : index
    %c0_24 = arith.constant 0 : index
    %36 = vector.load %arg7[%c4, %c0_24] : memref<8x128xf32, #tpu.memory_space<vmem>>, vector<1x128xf32>
    %37 = vector.broadcast %36 : vector<1x128xf32> to vector<8x128xf32>
    %38 = arith.addf %35, %37 : vector<8x128xf32>
    %39 = vector.extract_strided_slice %38 {offsets = [0, 0], sizes = [8, 8], strides = [1, 1]} : vector<8x128xf32> to vector<8x8xf32>
    %c0_25 = arith.constant 0 : index
    %c0_26 = arith.constant 0 : index
    %40 = vector.load %arg8[%c0_25, %c0_26] : memref<8x8xf32, #tpu.memory_space<vmem>>, vector<8x8xf32>
    tpu.vector_store %arg8[%c0_25, %c0_26], %39 {strides = array<i32>} : memref<8x8xf32, #tpu.memory_space<vmem>>, vector<8x8xf32>,
    return
  }
  func.func @transform_0(%arg0: i32) -> (i32, i32) {
    %c0_i32 = arith.constant 0 : i32
    %c0_i32_0 = arith.constant 0 : i32
    return %arg0, %c0_i32 : i32, i32
  }
  func.func @transform_1(%arg0: i32) -> (i32, i32) {
    %c0_i32 = arith.constant 0 : i32
    %c0_i32_0 = arith.constant 0 : i32
    %c0_i32_1 = arith.constant 0 : i32
    return %c0_i32, %c0_i32_0 : i32, i32
  }
  func.func @transform_2(%arg0: i32) -> (i32, i32) {
    %c0_i32 = arith.constant 0 : i32
    %c0_i32_0 = arith.constant 0 : i32
    %c0_i32_1 = arith.constant 0 : i32
    return %c0_i32, %c0_i32_0 : i32, i32
  }
  func.func @transform_3(%arg0: i32) -> (i32, i32) {
    %c0_i32 = arith.constant 0 : i32
    %c0_i32_0 = arith.constant 0 : i32
    %c0_i32_1 = arith.constant 0 : i32
    return %c0_i32, %c0_i32_0 : i32, i32
  }
  func.func @transform_4(%arg0: i32) -> (i32, i32) {
    %c0_i32 = arith.constant 0 : i32
    %c0_i32_0 = arith.constant 0 : i32
    %c0_i32_1 = arith.constant 0 : i32
    return %c0_i32, %c0_i32_0 : i32, i32
  }
  func.func @transform_5(%arg0: i32) -> (i32, i32) {
    %c0_i32 = arith.constant 0 : i32
    %c0_i32_0 = arith.constant 0 : i32
    %c0_i32_1 = arith.constant 0 : i32
    return %c0_i32, %c0_i32_0 : i32, i32
  }
  func.func @transform_6(%arg0: i32) -> (i32, i32) {
    %c0_i32 = arith.constant 0 : i32
    %c0_i32_0 = arith.constant 0 : i32
    %c0_i32_1 = arith.constant 0 : i32
    return %c0_i32, %c0_i32_0 : i32, i32
  }
  func.func @transform_7(%arg0: i32) -> (i32, i32) {
    %c0_i32 = arith.constant 0 : i32
    %c0_i32_0 = arith.constant 0 : i32
    return %arg0, %c0_i32 : i32, i32
  }
}

</mosaic_0001>

<bundles_post_ra>
// kernel: tpu_custom_call.1
= control target key start
LH: loop header
LB: loop body
LE: loop exit
PB: predicated region body
PF: predicated region fallthrough
CT: control target
= control target key end

     0   :  { %12 = vsyncpa [#allocation3], 0  ;;  %s1902_s0 = inlined_call_operand.hbm [shape: f32[12,32], index: 0, kind: input, shape index: {}]   ;;  %s1903_s1 = inlined_call_operand.hbm [shape: bf16[32,128], index: 1, kind: input, shape index: {}]   ;;  %s1904_s2 = inlined_call_operand.hbm [shape: bf16[128,128], index: 2, kind: input, shape index: {}]   ;;  %s1905_s3 = inlined_call_operand.hbm [shape: bf16[128,128], index: 3, kind: input, shape index: {}]   ;;  %s1906_s4 = inlined_call_operand.hbm [shape: bf16[128,128], index: 4, kind: input, shape index: {}]   ;;  %s1907_s5 = inlined_call_operand.hbm [shape: bf16[128,128], index: 5, kind: input, shape index: {}]   ;;  %s1908_s6 = inlined_call_operand.vmem [shape: f32[8,128], index: 6, kind: input, shape index: {}]   ;;  %s1909_s7 = inlined_call_operand.vmem [shape: f32[12,8], index: 7, kind: output, shape index: {}]  }
   0x1   :  { %14 = vsyncpa [#allocation3 + $0x1], 0 }
   0x2   :  { %15 = vsyncpa [#allocation5], 0 }
   0x3   :  { %16 = vsyncpa [#allocation8], 0 }
   0x4   :  { %17 = vsyncpa [#allocation11], 0  ;;  %s1577_s24 = smov 0   ;;  %s1579_s25 = smov 0  }
   0x5   :  { %s1581_s26 = smov 0   ;;  %s1583_s27 = smov 0  }
   0x6 LB: > { %s1527_s28 = smov [#allocation4]   ;;  %s1598_s30 = sadd.s32 4294967295, %s1525_s27   ;;  %s1525_s27 = sphi %s1583_s27, %s1928_s27   ;;  %s1521_s26 = sphi %s1581_s26, %s1927_s26   ;;  %s1517_s25 = sphi %s1579_s25, %s1926_s25   ;;  %s1513_s24 = sphi %s1577_s24, %s1925_s24  }
   0x7   : > { %s218_s29 = sshll.u32 %s1527_s28, 4  ;;  %p995_p0 = scmp.ge.s32.totalorder %s1525_s27, 1  ;;  %s1603_s29 = int_to_ptr.vmem [resolvable:$true] %s218_s29 }
   0x8   : > { %p1910_p1 = scmp.eq.s32.totalorder %s1598_s30, 0  ;;  %p206_p2 = scmp.lt.s32.totalorder %s1525_s27, 3 }
   0x9   : > { %s1528_s9 = smov [#allocation7]   ;;  %s1529_s12 = smov [#allocation6]  }
   0xa   : > { %p1605_p3 = pnand %p995_p0, %p206_p2  ;;  %s244_s10 = sshll.u32 %s1528_s9, 4  ;;  %s1617_s10 = int_to_ptr.vmem [resolvable:$true] %s244_s10 }
   0xb   : > { %s231_s13 = sshll.u32 %s1529_s12, 4  ;;  %s1309_s16 = scalar_lea.hbm %s1903_s1, 256  ;;  %s1619_s13 = int_to_ptr.vmem [resolvable:$true] %s231_s13 }
   0xc   : > { %s1912_s8 = scalar_select %p1605_p3, 1, 0 }
   0xd   : > { %p1203_p4 = pneg %p1605_p3  ;;  %p1310_p6 = scmp.ne.s32.totalorder %s1903_s1, %s1309_s16 }
   0xe   : > { %p1316_p10 = scmp.lt.u32.totalorder %s1309_s16, %s1903_s1 }
   0xf   : > { %p1613_p5 = pnand %p1203_p4, %p1910_p1 }
  0x11   : > { %p1629_p7 = pneg %p1613_p5 }
  0x13   : > { %p1312_p8 = pnand %p1629_p7, %p1310_p6 }
  0x15   : > { %p1313_p9 = pneg %p1312_p8 }
  0x17   : > { %p1318_p11 = pnand %p1316_p10, %p1313_p9 }
  0x19   : > { %1321 = shalt.err (!%p1318_p11)
}
  0x1a   : > { %s1322_s22 = scalar_lea.vmem %s1603_s29, 256  ;;  %p1330_p2 = scmp.lt.s32.totalorder %s1603_s29, %s1603_s29 }
  0x1b   : > { %p1323_p12 = scmp.ne.s32.totalorder %s1603_s29, %s1322_s22  ;;  %p1331_p4 = scmp.lt.s32.totalorder %s1322_s22, %s1322_s22 }
  0x1d   : > { %p1325_p13 = pnand %p1323_p12, %p1629_p7  ;;  %p1332_p6 = por %p1331_p4, %p1330_p2 }
  0x1f   : > { %p1326_p0 = pneg %p1325_p13 }
  0x21   : > { %p1333_p8 = pnand %p1332_p6, %p1326_p0 }
  0x23   : > { %1336 = shalt.err (!%p1333_p8)
}
  0x24   : > { %s1530_s23 = smov 64   ;;  %s1531_s28 = smov 4  }
  0x25   : > { %1206 = dma.hbm_to_vmem [thread:$0]  (!%p1613_p5), %s1903_s1, 256, %s1603_s29, [#allocation5], %s1530_s23, %s1530_s23, %s1531_s28  }
  0x26   : > { %s1337_s16 = scalar_lea.hbm %s1905_s3, 1024 }
  0x27   : > { %p1338_p9 = scmp.ne.s32.totalorder %s1905_s3, %s1337_s16  ;;  %p1344_p12 = scmp.lt.u32.totalorder %s1337_s16, %s1905_s3 }
  0x29   : > { %p1340_p10 = pnand %p1338_p9, %p1629_p7 }
  0x2b   : > { %p1341_p11 = pneg %p1340_p10 }
  0x2d   : > { %p1346_p13 = pnand %p1344_p12, %p1341_p11 }
  0x2f   : > { %1349 = shalt.err (!%p1346_p13)
}
  0x30   : > { %s1350_s29 = scalar_lea.vmem %s1617_s10, 1024  ;;  %p1358_p6 = scmp.lt.s32.totalorder %s1617_s10, %s1617_s10 }
  0x31   : > { %p1351_p0 = scmp.ne.s32.totalorder %s1617_s10, %s1350_s29  ;;  %p1359_p8 = scmp.lt.s32.totalorder %s1350_s29, %s1350_s29 }
  0x33   : > { %p1353_p2 = pnand %p1351_p0, %p1629_p7  ;;  %p1360_p9 = por %p1359_p8, %p1358_p6 }
  0x35   : > { %p1354_p4 = pneg %p1353_p2 }
  0x37   : > { %p1361_p10 = pnand %p1360_p9, %p1354_p4 }
  0x39   : > { %1364 = shalt.err (!%p1361_p10)
}
  0x3a   : > { %1212 = dma.hbm_to_vmem [thread:$0]  (!%p1613_p5), %s1905_s3, 1024, %s1617_s10, [#allocation8], %s1530_s23, %s1530_s23, %s1531_s28  }
  0x3b   : > { %s1365_s15 = scalar_lea.hbm %s1904_s2, 1024 }
  0x3c   : > { %p1366_p11 = scmp.ne.s32.totalorder %s1904_s2, %s1365_s15  ;;  %p1372_p0 = scmp.lt.u32.totalorder %s1365_s15, %s1904_s2 }
  0x3e   : > { %p1368_p12 = pnand %p1366_p11, %p1629_p7 }
  0x40   : > { %p1369_p13 = pneg %p1368_p12 }
  0x42   : > { %p1374_p2 = pnand %p1372_p0, %p1369_p13 }
  0x44   : > { %1377 = shalt.err (!%p1374_p2)
}
  0x45   : > { %s1378_s10 = scalar_lea.vmem %s1619_s13, 1024  ;;  %p1386_p9 = scmp.lt.s32.totalorder %s1619_s13, %s1619_s13 }
  0x46   : > { %p1379_p4 = scmp.ne.s32.totalorder %s1619_s13, %s1378_s10  ;;  %p1387_p10 = scmp.lt.s32.totalorder %s1378_s10, %s1378_s10 }
  0x48   : > { %p1381_p6 = pnand %p1379_p4, %p1629_p7  ;;  %p1388_p11 = por %p1387_p10, %p1386_p9 }
  0x4a   : > { %p1382_p8 = pneg %p1381_p6 }
  0x4c   : > { %p1389_p12 = pnand %p1388_p11, %p1382_p8 }
  0x4e   : > { %1392 = shalt.err (!%p1389_p12)
}
  0x4f   : > { %1209 = dma.hbm_to_vmem [thread:$0]  (!%p1613_p5), %s1904_s2, 1024, %s1619_s13, [#allocation5], %s1530_s23, %s1530_s23, %s1531_s28  }
  0x50   : > { %s1532_s22 = smov [#allocation9]   ;;  %s1533_s12 = smov [#allocation10]  }
  0x51   : > { %s257_s9 = sshll.u32 %s1532_s22, 4  ;;  %s270_s14 = sshll.u32 %s1533_s12, 4  ;;  %s258_s9 = int_to_ptr.vmem [resolvable:$true] %s257_s9  ;;  %s271_s14 = int_to_ptr.vmem [resolvable:$true] %s270_s14 }
  0x52   : > { %s1393_s17 = scalar_lea.hbm %s1906_s4, 1024 }
  0x53   : > { %p1394_p13 = scmp.ne.s32.totalorder %s1906_s4, %s1393_s17  ;;  %p1400_p4 = scmp.lt.u32.totalorder %s1393_s17, %s1906_s4 }
  0x55   : > { %p1396_p0 = pnand %p1394_p13, %p1629_p7 }
  0x57   : > { %p1397_p2 = pneg %p1396_p0 }
  0x59   : > { %p1402_p6 = pnand %p1400_p4, %p1397_p2 }
  0x5b   : > { %1405 = shalt.err (!%p1402_p6)
}
  0x5c   : > { %s1406_s13 = scalar_lea.vmem %s258_s9, 1024  ;;  %p1414_p11 = scmp.lt.s32.totalorder %s258_s9, %s258_s9 }
  0x5d   : > { %p1407_p8 = scmp.ne.s32.totalorder %s258_s9, %s1406_s13  ;;  %p1415_p12 = scmp.lt.s32.totalorder %s1406_s13, %s1406_s13 }
  0x5f   : > { %p1409_p9 = pnand %p1407_p8, %p1629_p7  ;;  %p1416_p1 = por %p1415_p12, %p1414_p11 }
  0x61   : > { %p1410_p10 = pneg %p1409_p9 }
  0x63   : > { %p1417_p3 = pnand %p1416_p1, %p1410_p10 }
  0x65   : > { %1420 = shalt.err (!%p1417_p3)
}
  0x66   : > { %1215 = dma.hbm_to_vmem [thread:$0]  (!%p1613_p5), %s1906_s4, 1024, %s258_s9, [#allocation8], %s1530_s23, %s1530_s23, %s1531_s28  }
  0x67   : > { %s1421_s16 = scalar_lea.hbm %s1907_s5, 1024 }
  0x68   : > { %p1422_p1 = scmp.ne.s32.totalorder %s1907_s5, %s1421_s16  ;;  %p1428_p0 = scmp.lt.u32.totalorder %s1421_s16, %s1907_s5 }
  0x6a   : > { %p1424_p3 = pnand %p1422_p1, %p1629_p7 }
  0x6c   : > { %p1425_p13 = pneg %p1424_p3 }
  0x6e   : > { %p1430_p2 = pnand %p1428_p0, %p1425_p13 }
  0x70   : > { %1433 = shalt.err (!%p1430_p2)
}
  0x71   : > { %s1434_s21 = scalar_lea.vmem %s271_s14, 1024  ;;  %p1442_p9 = scmp.lt.s32.totalorder %s271_s14, %s271_s14 }
  0x72   : > { %p1435_p4 = scmp.ne.s32.totalorder %s271_s14, %s1434_s21  ;;  %p1443_p10 = scmp.lt.s32.totalorder %s1434_s21, %s1434_s21 }
  0x74   : > { %p1437_p6 = pnand %p1435_p4, %p1629_p7  ;;  %p1444_p11 = por %p1443_p10, %p1442_p9 }
  0x76   : > { %p1438_p8 = pneg %p1437_p6 }
  0x78   : > { %p1445_p12 = pnand %p1444_p11, %p1438_p8 }
  0x7a   : > { %1448 = shalt.err (!%p1445_p12)
}
  0x7b   : > { %1218 = dma.hbm_to_vmem [thread:$0]  (!%p1613_p5), %s1907_s5, 1024, %s271_s14, [#allocation11], %s1530_s23, %s1530_s23, %s1531_s28  }
  0x7c   : > { %s1748_s11 = sadd.s32 1, %s1525_s27   ;;  %s30_s29 = sadd.s32 1, %s1521_s26 }
  0x7d   : > { %s27_s19 = ssub.s32 %s1525_s27, %s1748_s11  ;;  %p37_p1 = scmp.ne.s32.totalorder %s1521_s26, %s1517_s25 }
  0x7e   : > { %p28_p7 = scmp.eq.s32.totalorder %s27_s19, 0  ;;  %p38_p3 = scmp.eq.s32.totalorder %s1525_s27, 0 }
  0x7f   : > { %p43_p13 = scmp.ne.s32.totalorder %s1517_s25, %s1513_s24  ;;  %p1915_p2 = scmp.eq.s32.totalorder %s1598_s30, 0 }
  0x80   : > { %s1759_s22 = scalar_select %p28_p7, %s1521_s26, %s30_s29  }
  0x81   : > { %p39_p0 = por %p38_p3, %p37_p1  ;;  %p1763_p4 = por %p1915_p2, %p43_p13 }
  0x82   : > { %p1228_p6 = scmp.lt.s32.totalorder %s1525_s27, 2  ;;  %s287_s15 = sand.u32 1, %s1521_s26  }
  0x83   : > { %s1002_s23 = sshll.u32 %s287_s15, 3  ;;  %s1003_s28 = sshll.u32 %s1525_s27, 7 }
  0x84   : > { %s1773_s17 = scalar_lea.hbm %s1902_s0, %s1003_s28  ;;  %s291_s24 = scalar_lea.vmem [#allocation2], %s1002_s23 }
  0x85   : > { %s298_s18 = sshll.u32 %s291_s24, 4  ;;  %p1777_p5 = pnand %p1228_p6, %p39_p0  ;;  %s1775_s18 = int_to_ptr.vmem [resolvable:$true] %s298_s18 }
  0x86   : > { %s288_s27 = scalar_lea.sflag [#allocation3], %s287_s15  ;;  %s1449_s10 = scalar_lea.hbm %s1773_s17, 128 }
  0x87   : > { %p1450_p8 = scmp.ne.s32.totalorder %s1773_s17, %s1449_s10  ;;  %p1451_p9 = pneg %p1777_p5 }
  0x88   : > { %s1454_s13 = scalar_lea.hbm %s1902_s0, 256  ;;  %p1455_p12 = scmp.lt.u32.totalorder %s1773_s17, %s1902_s0 }
  0x89   : > { %p1452_p10 = pnand %p1451_p9, %p1450_p8  ;;  %p1456_p7 = scmp.lt.u32.totalorder %s1454_s13, %s1449_s10 }
  0x8a   : > { %p1458_p3 = scmp.lt.u32.totalorder %s1449_s10, %s1773_s17 }
  0x8b   : > { %p1453_p11 = pneg %p1452_p10  ;;  %p1457_p1 = por %p1456_p7, %p1455_p12 }
  0x8d   : > { %p1459_p13 = por %p1458_p3, %p1457_p1 }
  0x8f   : > { %p1460_p0 = pnand %p1459_p13, %p1453_p11 }
  0x91   : > { %1463 = shalt.err (!%p1460_p0)
}
  0x92   : > { %s1464_s15 = scalar_lea.vmem %s1775_s18, 128  ;;  %s1534_s23 = smov [#allocation2]  }
  0x93   : > { %p1465_p2 = scmp.ne.s32.totalorder %s1775_s18, %s1464_s15  ;;  %s1469_s28 = sshll.u32 %s1534_s23, 4  ;;  %s1470_s28 = int_to_ptr.vmem [resolvable:$false] %s1469_s28 }
  0x94   : > { %s1471_s14 = scalar_lea.vmem %s1470_s28, 256  ;;  %p1472_p10 = scmp.lt.s32.totalorder %s1775_s18, %s1470_s28 }
  0x95   : > { %p1467_p6 = pnand %p1465_p2, %p1451_p9  ;;  %p1473_p12 = scmp.lt.s32.totalorder %s1471_s14, %s1464_s15 }
  0x97   : > { %p1468_p8 = pneg %p1467_p6  ;;  %p1474_p7 = por %p1473_p12, %p1472_p10 }
  0x99   : > { %p1475_p1 = pnand %p1474_p7, %p1468_p8 }
  0x9b   : > { %1478 = shalt.err (!%p1475_p1)
}
  0x9c   : > { %1222 = dma.hbm_to_vmem [thread:$0]  (!%p1777_p5), %s1773_s17, 128, %s1775_s18, %s288_s27  }
  0x9d   : > { %p1918_p11 = scmp.ne.s32.totalorder %s1912_s8, 0 }
  0x9e   : > { %s309_s16 = sand.u32 (!%p1918_p11), 1, %s1517_s25  }
  0x9f   : > { %307 = sbr.rel (%p1918_p11) target bundleno = 1274 (0x4fa), region = 48  ;;  %s1005_s24 = sshll.u32 (!%p1918_p11), %s309_s16, 3 }
  0xa0   : > { %s310_s10 = scalar_lea.sflag (!%p1918_p11), [#allocation3], %s309_s16  ;;  %s313_s21 = scalar_lea.vmem (!%p1918_p11), [#allocation2], %s1005_s24 }
  0xa6   : > { %1496 = dma.done.wait (%p1763_p4), %s310_s10, 128  }
  0xa7   : > { %1498 = vsyncadd (%p1763_p4), %s310_s10, 4294967168  ;;  %p1919_p9 = scmp.eq.s32.totalorder %s1598_s30, 0 }
  0xa9   : > { %1500 = dma.done.wait (%p1919_p9), [#allocation5], 1280   ;;  %p1920_p3 = pmov %p1919_p9 }
  0xab   : > { %1502 = vsyncadd (%p1920_p3), [#allocation5], 4294966016  ;;  %p1921_p5 = pmov %p1920_p3 }
  0xac   : > { %p1922_p13 = pmov %p1920_p3 }
  0xad   : > { %1504 = dma.done.wait (%p1921_p5), [#allocation8], 2048  }
  0xae   : > { %1506 = vsyncadd (%p1922_p13), [#allocation8], 4294965248  ;;  %p1923_p0 = pmov %p1920_p3 }
  0xb0   : > { %1508 = dma.done.wait (%p1923_p0), [#allocation11], 1024   ;;  %p1924_p2 = pmov %p1923_p0 }
  0xb1   : > { %v1535_v0 = vmov 0.0   ;;  %vm1536_vm0 = vmmov 0   ;;  %v1275_v1 = vld [vmem:[#allocation4] sm:$0xff]   ;;  %v1276_v2 = vld [vmem:[#allocation4 + $0x8] sm:$0xff]   ;;  %v368_v3 = vld [vmem:[%s313_s21] sm:$0xff]  ;;  %vm391_vm1 = vcmask 261120  }
  0xb2   : > { %1510 = vsyncadd (%p1924_p2), [#allocation11], 4294966272  ;;  %1093 = vmatprep.subr.bf16.mxu0 %v1535_v0  ;;  %1097 = vmatprep.mubr.msk.bf16.mxu0 %vm1536_vm0, %v1535_v0  ;;  %v1277_v4 = vld [vmem:[#allocation6] sm:$0xff]   ;;  %v369_v5 = vpack.c.bf16 %v368_v3, %v368_v3  ;;  %v1278_v6 = vld [vmem:[#allocation6 + $0x8] sm:$0xff]   ;;  %p363_p4 = scmp.lt.s32.totalorder %s1598_s30, 1  ;;  %vm879_vm2 = vcmask 64512  }
  0xb3   : > { %1101 = vmatprep.subr.bf16.mxu1 %v1535_v0  ;;  %1117 = vmatprep.mubr.msk.bf16.mxu1 %vm1536_vm0, %v1535_v0  ;;  %v1279_v7 = vld [vmem:[#allocation6 + $0x10] sm:$0xff]   ;;  %v1280_v8 = vld [vmem:[#allocation6 + $0x18] sm:$0xff]   ;;  %v1281_v9 = vld [vmem:[#allocation6 + $0x20] sm:$0xff]  }
  0xb4   : > { %1094 = vmatpush3.bf16.msra.mxu0 %v1275_v1  ;;  %1102 = vmatpush3.bf16.msra.mxu1 %v1277_v4  ;;  %v1282_v10 = vld [vmem:[#allocation6 + $0x28] sm:$0xff]   ;;  %v1283_v11 = vld [vmem:[#allocation6 + $0x30] sm:$0xff]   ;;  %v1284_v12 = vld [vmem:[#allocation6 + $0x38] sm:$0xff]   ;;  %s1930_s30 = smov (!%p363_p4, %s1598_s30), 1 }
  0xb5   : > { %1095 = vmatprep.subr.bf16.mxu0 %v1535_v0  ;;  %1103 = vmatprep.subr.bf16.mxu1 %v1535_v0  ;;  %v1285_v13 = vld [vmem:[#allocation7] sm:$0xff]   ;;  %v1286_v14 = vld [vmem:[#allocation7 + $0x8] sm:$0xff]   ;;  %v1287_v15 = vld [vmem:[#allocation7 + $0x10] sm:$0xff]   ;;  %s1011_s19 = sshll.u32 %s1930_s30, 3 }
  0xb6   : > { %v1288_v16 = vld [vmem:[#allocation7 + $0x18] sm:$0xff]   ;;  %v1289_v17 = vld [vmem:[#allocation7 + $0x20] sm:$0xff]   ;;  %v1290_v18 = vld [vmem:[#allocation7 + $0x28] sm:$0xff]   ;;  %s366_s14 = scalar_lea.vmem %s1909_s7, %s1011_s19 }
  0xb7   : > { %v1012_v19 = vld [vmem:[%s1908_s6] ss:$0 sm:$0xff]  ;;  %v1291_v27 = vld [vmem:[#allocation7 + $0x30] sm:$0xff]   ;;  %v1292_v28 = vld [vmem:[#allocation7 + $0x38] sm:$0xff]  }
  0xb8   : > { %1096 = vmatpush3.bf16.msra.mxu0 %v1276_v2  ;;  %1104 = vmatpush3.bf16.msra.mxu1 %v1278_v6  ;;  %v1293_v29 = vld [vmem:[#allocation9] sm:$0xff]   ;;  %v1294_v30 = vld [vmem:[#allocation9 + $0x8] sm:$0xff]   ;;  %v1295_v31 = vld [vmem:[#allocation9 + $0x10] sm:$0xff]  }
  0xb9   : > { %1121 = vmatprep.subr.bf16.mxu0 %v1535_v0  ;;  %1105 = vmatprep.subr.bf16.mxu1 %v1535_v0  ;;  %v1296_v32 = vld [vmem:[#allocation9 + $0x18] sm:$0xff]   ;;  %v1297_v33 = vld [vmem:[#allocation9 + $0x20] sm:$0xff]   ;;  %v1298_v34 = vld [vmem:[#allocation9 + $0x28] sm:$0xff]  }
  0xba   : > { %v1016_v35 = vld [vmem:[%s1908_s6 + $0x1] ss:$0 sm:$0xff]  ;;  %v1299_v43 = vld [vmem:[#allocation9 + $0x30] sm:$0xff]   ;;  %v1300_v44 = vld [vmem:[#allocation9 + $0x38] sm:$0xff]  }
  0xbb   : > { %1098 = vmatmul.mubr.msk.bf16.vlgmr.msra.gmra.mrb[0].mxu0 %vm391_vm1, %v369_v5  ;;  %v1301_v45 = vld [vmem:[#allocation10] sm:$0xff]   ;;  %v1302_v46 = vld [vmem:[#allocation10 + $0x8] sm:$0xff]   ;;  %v1303_v47 = vld [vmem:[#allocation10 + $0x10] sm:$0xff]  }
  0xbc   : > { %1137 = vmatprep.mubr.msk.bf16.mxu0 %vm1536_vm0, %v1535_v0  ;;  %1106 = vmatpush3.bf16.msra.mxu1 %v1279_v7  ;;  %v1304_v48 = vld [vmem:[#allocation10 + $0x18] sm:$0xff]   ;;  %v1305_v49 = vld [vmem:[#allocation10 + $0x20] sm:$0xff]   ;;  %v1306_v50 = vld [vmem:[#allocation10 + $0x28] sm:$0xff]  }
  0xbd   : > { %1107 = vmatprep.subr.bf16.mxu1 %v1535_v0  ;;  %1122 = vmatpush3.bf16.msra.mxu0 %v1285_v13  ;;  %v1025_v51 = vld [vmem:[%s1908_s6 + $0x2] ss:$0 sm:$0xff]  ;;  %v1307_v59 = vld [vmem:[#allocation10 + $0x30] sm:$0xff]   ;;  %v1308_v60 = vld [vmem:[#allocation10 + $0x38] sm:$0xff]  }
  0xbe   : > { %1123 = vmatprep.subr.bf16.mxu0 %v1535_v0  ;;  %v1034_v61 = vld [vmem:[%s1908_s6 + $0x3] ss:$0 sm:$0xff] }
  0xc0   : > { %1108 = vmatpush3.bf16.msra.mxu1 %v1280_v8 }
  0xc1   : > { %1109 = vmatprep.subr.bf16.mxu1 %v1535_v0  ;;  %1124 = vmatpush3.bf16.msra.mxu0 %v1286_v14 }
  0xc2   : > { %1125 = vmatprep.subr.bf16.mxu0 %v1535_v0 }
  0xc4   : > { %1110 = vmatpush3.bf16.msra.mxu1 %v1281_v9 }
  0xc5   : > { %1111 = vmatprep.subr.bf16.mxu1 %v1535_v0  ;;  %1126 = vmatpush3.bf16.msra.mxu0 %v1287_v15 }
  0xc6   : > { %1127 = vmatprep.subr.bf16.mxu0 %v1535_v0 }
  0xc8   : > { %1112 = vmatpush3.bf16.msra.mxu1 %v1282_v10 }
  0xc9   : > { %1113 = vmatprep.subr.bf16.mxu1 %v1535_v0  ;;  %1128 = vmatpush3.bf16.msra.mxu0 %v1288_v16 }
  0xca   : > { %1129 = vmatprep.subr.bf16.mxu0 %v1535_v0 }
  0xcc   : > { %1114 = vmatpush3.bf16.msra.mxu1 %v1283_v11 }
  0xcd   : > { %1115 = vmatprep.subr.bf16.mxu1 %v1535_v0  ;;  %1130 = vmatpush3.bf16.msra.mxu0 %v1289_v17 }
  0xce   : > { %1131 = vmatprep.subr.bf16.mxu0 %v1535_v0 }
  0xd0   : > { %1116 = vmatpush3.bf16.msra.mxu1 %v1284_v12 }
  0xd1   : > { %1141 = vmatprep.subr.bf16.mxu1 %v1535_v0  ;;  %1132 = vmatpush3.bf16.msra.mxu0 %v1290_v18 }
  0xd2   : > { %1133 = vmatprep.subr.bf16.mxu0 %v1535_v0 }
  0xd5   : > { %1134 = vmatpush3.bf16.msra.mxu0 %v1291_v27 }
  0xd6   : > { %1135 = vmatprep.subr.bf16.mxu0 %v1535_v0 }
  0xd9   : > { %1136 = vmatpush3.bf16.msra.mxu0 %v1292_v28 }
  0xda   : > { %1161 = vmatprep.subr.bf16.mxu0 %v1535_v0 }
 0x18e   : > { %v429_v20 = vpop.f32.mrb[0].mxu0 }
 0x18f   : > { %v430_v21 = vadd.f32 %v1012_v19, %v429_v20  ;;  %v1099_v22 = vpop.f32.mrb[1].mxu0 }
 0x190   : > { %v432_v23 = vpop.f32.mrb[2].mxu0 }
 0x191   : > { %v435_v24 = vmax.f32 %v430_v21, 0.0  ;;  %v1100_v25 = vpop.f32.mrb[3].mxu0 }
 0x193   : > { %v436_v26 = vpack.c.bf16 %v435_v24, %v435_v24 }
 0x195   : > { %1118 = vmatmul.mubr.bf16.vlgmr.msra.gmra.mrb[0].mxu1 %v436_v26 }
 0x196   : > { %1157 = vmatprep.mubr.msk.bf16.mxu1 %vm1536_vm0, %v1535_v0  ;;  %1142 = vmatpush3.bf16.msra.mxu1 %v1293_v29 }
 0x197   : > { %1143 = vmatprep.subr.bf16.mxu1 %v1535_v0 }
 0x19a   : > { %1144 = vmatpush3.bf16.msra.mxu1 %v1294_v30 }
 0x19b   : > { %1145 = vmatprep.subr.bf16.mxu1 %v1535_v0 }
 0x19e   : > { %1146 = vmatpush3.bf16.msra.mxu1 %v1295_v31 }
 0x19f   : > { %1147 = vmatprep.subr.bf16.mxu1 %v1535_v0 }
 0x1a2   : > { %1148 = vmatpush3.bf16.msra.mxu1 %v1296_v32 }
 0x1a3   : > { %1149 = vmatprep.subr.bf16.mxu1 %v1535_v0 }
 0x1a6   : > { %1150 = vmatpush3.bf16.msra.mxu1 %v1297_v33 }
 0x1a7   : > { %1151 = vmatprep.subr.bf16.mxu1 %v1535_v0 }
 0x1aa   : > { %1152 = vmatpush3.bf16.msra.mxu1 %v1298_v34 }
 0x1ab   : > { %1153 = vmatprep.subr.bf16.mxu1 %v1535_v0 }
 0x1ae   : > { %1154 = vmatpush3.bf16.msra.mxu1 %v1299_v43 }
 0x1af   : > { %1155 = vmatprep.subr.bf16.mxu1 %v1535_v0 }
 0x1b2   : > { %1156 = vmatpush3.bf16.msra.mxu1 %v1300_v44 }
 0x268   : > { %v540_v36 = vpop.f32.mrb[0].mxu1 }
 0x269   : > { %v541_v37 = vadd.f32 %v1016_v35, %v540_v36  ;;  %v1119_v38 = vpop.f32.mrb[1].mxu1 }
 0x26a   : > { %v543_v39 = vpop.f32.mrb[2].mxu1 }
 0x26b   : > { %v546_v40 = vmax.f32 %v541_v37, 0.0  ;;  %v1120_v41 = vpop.f32.mrb[3].mxu1 }
 0x26d   : > { %v547_v42 = vpack.c.bf16 %v546_v40, %v546_v40 }
 0x26f   : > { %1138 = vmatmul.mubr.bf16.vlgmr.msra.gmra.mrb[4].mxu0 %v547_v42 }
 0x270   : > { %1177 = vmatprep.mubr.msk.bf16.mxu0 %vm1536_vm0, %v1535_v0  ;;  %1162 = vmatpush3.bf16.msra.mxu0 %v1301_v45 }
 0x271   : > { %1163 = vmatprep.subr.bf16.mxu0 %v1535_v0 }
 0x274   : > { %1164 = vmatpush3.bf16.msra.mxu0 %v1302_v46 }
 0x275   : > { %1165 = vmatprep.subr.bf16.mxu0 %v1535_v0 }
 0x278   : > { %1166 = vmatpush3.bf16.msra.mxu0 %v1303_v47 }
 0x279   : > { %1167 = vmatprep.subr.bf16.mxu0 %v1535_v0 }
 0x27c   : > { %1168 = vmatpush3.bf16.msra.mxu0 %v1304_v48 }
 0x27d   : > { %1169 = vmatprep.subr.bf16.mxu0 %v1535_v0 }
 0x280   : > { %1170 = vmatpush3.bf16.msra.mxu0 %v1305_v49 }
 0x281   : > { %1171 = vmatprep.subr.bf16.mxu0 %v1535_v0 }
 0x284   : > { %1172 = vmatpush3.bf16.msra.mxu0 %v1306_v50 }
 0x285   : > { %1173 = vmatprep.subr.bf16.mxu0 %v1535_v0 }
 0x288   : > { %1174 = vmatpush3.bf16.msra.mxu0 %v1307_v59 }
 0x289   : > { %1175 = vmatprep.subr.bf16.mxu0 %v1535_v0  ;;  %v1043_v0 = vld [vmem:[%s1908_s6 + $0x4] ss:$0 sm:$0xff] }
 0x28c   : > { %1176 = vmatpush3.bf16.msra.mxu0 %v1308_v60 }
 0x342   : > { %v651_v52 = vpop.f32.mrb[4].mxu0 }
 0x343   : > { %v652_v53 = vadd.f32 %v1025_v51, %v651_v52  ;;  %v1139_v54 = vpop.f32.mrb[5].mxu0 }
 0x344   : > { %v654_v55 = vpop.f32.mrb[6].mxu0 }
 0x345   : > { %v657_v56 = vmax.f32 %v652_v53, 0.0  ;;  %v1140_v57 = vpop.f32.mrb[7].mxu0 }
 0x347   : > { %v658_v58 = vpack.c.bf16 %v657_v56, %v657_v56 }
 0x349   : > { %1158 = vmatmul.mubr.bf16.vlgmr.msra.gmra.mrb[4].mxu1 %v658_v58 }
 0x41c   : > { %v762_v62 = vpop.f32.mrb[4].mxu1 }
 0x41d   : > { %v763_v63 = vadd.f32 %v1034_v61, %v762_v62  ;;  %v1159_v1 = vpop.f32.mrb[5].mxu1 }
 0x41e   : > { %v765_v2 = vpop.f32.mrb[6].mxu1 }
 0x41f   : > { %v768_v3 = vmax.f32 %v763_v63, 0.0  ;;  %v1160_v4 = vpop.f32.mrb[7].mxu1 }
 0x421   : > { %v769_v5 = vpack.c.bf16 %v768_v3, %v768_v3 }
 0x423   : > { %1178 = vmatmul.mubr.bf16.vlgmr.msra.gmra.mrb[8].mxu0 %v769_v5 }
 0x4f6   : > { %v873_v6 = vpop.f32.mrb[8].mxu0 }
 0x4f7   : > { %v874_v7 = vadd.f32 %v1043_v0, %v873_v6  ;;  %v1179_v8 = vpop.f32.mrb[9].mxu0 }
 0x4f8   : > { %v876_v9 = vpop.f32.mrb[10].mxu0 }
 0x4f9   : > { %880 = vst.msk [vmem:[%s366_s14] sm:$0xff] %vm879_vm2, %v874_v7  ;;  %v1180_v10 = vpop.f32.mrb[11].mxu0 }
 0x4fa PF: > { %p20_p6 = scmp.ge.s32.totalorder %s1748_s11, 4   ;;  %s1925_s24 = smov %s1517_s25 }
 0x4fb   : > { %s1926_s25 = smov %s1521_s26  ;;  %s1927_s26 = smov %s1759_s22 }
 0x4fc   : > { %s1928_s27 = smov %s1748_s11  ;;  %22 = sbr.rel (!%p20_p6) target bundleno = 6 (0x6), region = 108 }
 0x503   :  { %900 = vsyncpa [#allocation3], 1 }
 0x504   :  { %902 = vsyncpa [#allocation3 + $0x1], 1 }
 0x505   :  { %903 = vsyncpa [#allocation5], 1 }
 0x506   :  { %904 = vsyncpa [#allocation8], 1 }
 0x507   :  { %905 = vsyncpa [#allocation11], 1 }

</bundles_post_ra>
